<compile_context>
chip_gen: v5e
topology: v5e:2x2
jax: 0.10.0
libtpu: 0.0.40
codegen_flags: <defaults>
</compile_context>

<pallas_src>
import jax
import jax.numpy as jnp
from jax import lax
from jax.experimental import pallas as pl
from jax.experimental.pallas import tpu as pltpu

N_EMBD = 64 * 4                     # 256, fixed by the module
NUM_HEADS = 4
HEAD_SIZE = N_EMBD // NUM_HEADS     # 64
SCALE = float(N_EMBD) ** -0.5       # module scales by C**-0.5 with C = n_embd
NEG_BIG = -1e30                     # large finite negative (robust masked fill)


# ---------------------------------------------------------------------------
# Single fused kernel (per batch element):
#   qkv = x @ W_qkv                              (T, 3C)  -- one wide MXU matmul
#   for each head h:
#       wei = softmax(mask(q_h k_h^T * scale))   (T, T)
#       y  += (wei @ v_h) @ Wp[h*hs:(h+1)*hs]    (T, C)   -- fused output proj
#   out = y + b_p
# ---------------------------------------------------------------------------
def mha_fused_kernel(x_ref, wqkv_ref, wp_ref, bp_ref, o_ref):
    x = x_ref[0]                                            # (T, C)
    T = x.shape[0]
    C = x.shape[1]

    # Fused QKV projection: lane-dense 768-wide output, one MXU pass.
    qkv = jnp.dot(x, wqkv_ref[...], preferred_element_type=jnp.float32)  # (T, 3C)

    # Causal mask, built once (hoisted out of the head loop).
    row = lax.broadcasted_iota(jnp.int32, (T, T), 0)
    col = lax.broadcasted_iota(jnp.int32, (T, T), 1)
    causal = col <= row

    y = jnp.zeros((T, C), jnp.float32)
    for h in range(NUM_HEADS):                              # static unroll (H=4)
        lo = h * HEAD_SIZE
        hi = lo + HEAD_SIZE
        q = qkv[:, lo:hi]                                   # (T, hs)
        k = qkv[:, C + lo:C + hi]                           # (T, hs)
        v = qkv[:, 2 * C + lo:2 * C + hi]                   # (T, hs)

        # q k^T via dot_general on the last axes (no explicit transpose of k).
        wei = lax.dot_general(
            q, k, dimension_numbers=(((1,), (1,)), ((), ())),
            preferred_element_type=jnp.float32) * SCALE     # (T, T)
        wei = jnp.where(causal, wei, NEG_BIG)

        # Numerically-stable softmax; normalize via EUP reciprocal (not VPU divide).
        m = jnp.max(wei, axis=-1, keepdims=True)
        e = jnp.exp(wei - m)
        inv = pl.reciprocal(jnp.sum(e, axis=-1, keepdims=True), approx=True)
        p = e * inv                                         # (T, T)

        out_h = jnp.dot(p, v, preferred_element_type=jnp.float32)        # (T, hs)
        # Fused output projection: accumulate this head's contribution.
        y = y + jnp.dot(out_h, wp_ref[lo:hi, :],
                        preferred_element_type=jnp.float32)              # (T, C)

    o_ref[0] = (y + bp_ref[...]).astype(o_ref.dtype)


@jax.jit
def multi_head_attention(x, wq, wk, wv, wp, bp):
    """x: (B, T, C); wq/wk/wv: (H, C, hs); wp: (C, C) (pre-transposed); bp: (1, C)."""
    B, T, C = x.shape
    H, _, hs = wq.shape

    # Pack per-head weights into one lane-dense (C, 3*C) matrix:
    # columns [h*hs:(h+1)*hs] of each C-wide block hold head h's weights.
    wq_cat = jnp.transpose(wq, (1, 0, 2)).reshape(C, H * hs)   # (C, C)
    wk_cat = jnp.transpose(wk, (1, 0, 2)).reshape(C, H * hs)
    wv_cat = jnp.transpose(wv, (1, 0, 2)).reshape(C, H * hs)
    w_qkv = jnp.concatenate([wq_cat, wk_cat, wv_cat], axis=1)  # (C, 3C)

    out = pl.pallas_call(
        mha_fused_kernel,
        out_shape=jax.ShapeDtypeStruct((B, T, C), x.dtype),
        grid_spec=pltpu.PrefetchScalarGridSpec(
            num_scalar_prefetch=0,
            grid=(B,),
            in_specs=[
                pl.BlockSpec((1, T, C), lambda b: (b, 0, 0)),       # x[b]
                pl.BlockSpec((C, 3 * C), lambda b: (0, 0)),         # packed W_qkv
                pl.BlockSpec((C, C), lambda b: (0, 0)),             # Wp (pre-transposed)
                pl.BlockSpec((1, C), lambda b: (0, 0)),             # bias
            ],
            out_specs=pl.BlockSpec((1, T, C), lambda b: (b, 0, 0)),
        ),
        compiler_params=pltpu.CompilerParams(
            dimension_semantics=("parallel",)),
    )(x, w_qkv, wp, bp)

    return out


# ---------------------------------------------------------------------------
# Pure-JAX reference (same math) for a sanity check
# ---------------------------------------------------------------------------
def reference(x, wq, wk, wv, wp, bp):
    B, T, C = x.shape
    scale = C ** (-0.5)
    outs = []
    for h in range(wq.shape[0]):
        q = x @ wq[h]
        k = x @ wk[h]
        v = x @ wv[h]
        wei = (q @ jnp.swapaxes(k, -1, -2)) * scale
        mask = jnp.tril(jnp.ones((T, T), dtype=bool))
        wei = jnp.where(mask, wei, -jnp.inf)
        wei = jax.nn.softmax(wei, axis=-1)
        outs.append(wei @ v)
    cat = jnp.concatenate(outs, axis=-1)
    return cat @ wp + bp


if __name__ == "__main__":
    key = jax.random.PRNGKey(0)
    B, T, C, H, hs = 2, 8, N_EMBD, NUM_HEADS, HEAD_SIZE

    kx, kq, kk, kv, kp, kb = jax.random.split(key, 6)
    x = jax.random.normal(kx, (B, T, C), dtype=jnp.float32)
    # nn.Linear(in=C, out=hs, bias=False): y = x @ W^T; store W^T directly as (C, hs)
    wq = jax.random.normal(kq, (H, C, hs), dtype=jnp.float32) * 0.02
    wk = jax.random.normal(kk, (H, C, hs), dtype=jnp.float32) * 0.02
    wv = jax.random.normal(kv, (H, C, hs), dtype=jnp.float32) * 0.02
    # nn.Linear(C, C) with bias: store W^T as (C, C), bias as (1, C)
    wp = jax.random.normal(kp, (C, C), dtype=jnp.float32) * 0.02
    bp = jax.random.normal(kb, (1, C), dtype=jnp.float32) * 0.02

    out = multi_head_attention(x, wq, wk, wv, wp, bp)
    out = jax.block_until_ready(out)

    ref = reference(x, wq, wk, wv, wp, bp)
    assert out.shape == (B, T, C)
    # approx=True reciprocal trades a few mantissa bits for an EUP-slot normalize
    assert jnp.allclose(out, ref, atol=1e-3, rtol=1e-3), "mismatch vs reference"

    print("KERNEL_OK")
</pallas_src>

<mosaic_0001>
module attributes {stable_mosaic.version = 11 : i64} {
  func.func @mha_fused_kernel(%arg0: i32, %arg1: memref<1x8x256xf32, #tpu.memory_space<vmem>>, %arg2: memref<256x768xf32, #tpu.memory_space<vmem>>, %arg3: memref<256x256xf32, #tpu.memory_space<vmem>>, %arg4: memref<1x256xf32, #tpu.memory_space<vmem>>, %arg5: memref<1x8x256xf32, #tpu.memory_space<vmem>>) attributes {dimension_semantics = [#tpu.dimension_semantics<parallel>], iteration_bounds = array<i64: 2>, scalar_prefetch = 0 : i64, scratch_operands = 0 : i64, tpu.core_type = #tpu.core_type<tc>, window_params = [{transform_indices = @transform_0, window_bounds = array<i64: 1, 8, 256>}, {pipeline_mode = #tpu.pipeline_mode<synchronous>, transform_indices = @transform_1, window_bounds = array<i64: 256, 768>}, {pipeline_mode = #tpu.pipeline_mode<synchronous>, transform_indices = @transform_2, window_bounds = array<i64: 256, 256>}, {pipeline_mode = #tpu.pipeline_mode<synchronous>, transform_indices = @transform_3, window_bounds = array<i64: 1, 256>}, {transform_indices = @transform_4, window_bounds = array<i64: 1, 8, 256>}]} {
    %c0 = arith.constant 0 : index
    %c0_0 = arith.constant 0 : index
    %c0_1 = arith.constant 0 : index
    %0 = vector.load %arg1[%c0, %c0_0, %c0_1] : memref<1x8x256xf32, #tpu.memory_space<vmem>>, vector<1x8x256xf32>
    %1 = vector.shape_cast %0 : vector<1x8x256xf32> to vector<8x256xf32>
    %c0_2 = arith.constant 0 : index
    %c0_3 = arith.constant 0 : index
    %2 = vector.load %arg2[%c0_2, %c0_3] : memref<256x768xf32, #tpu.memory_space<vmem>>, vector<256x768xf32>
    %cst = arith.constant dense<0.000000e+00> : vector<8x768xf32>
    %3 = tpu.matmul %1, %2, %cst {dimension_numbers = #tpu.dot_dimension_numbers<[1], [0], [0], [1], [0, 0, 1, 1], [], []>} : vector<8x256xf32>, vector<256x768xf32>, vector<8x768xf32> -> vector<8x768xf32>
    %4 = tpu.iota {dimensions = array<i32: 0>} : vector<8x8xi32>
    %5 = tpu.iota {dimensions = array<i32: 1>} : vector<8x8xi32>
    %6 = arith.cmpi sle, %5, %4 : vector<8x8xi32>
    %cst_4 = arith.constant 0.000000e+00 : f32
    %7 = vector.broadcast %cst_4 : f32 to vector<8x256xf32>
    %8 = vector.extract_strided_slice %3 {offsets = [0, 0], sizes = [8, 64], strides = [1, 1]} : vector<8x768xf32> to vector<8x64xf32>
    %9 = vector.extract_strided_slice %3 {offsets = [0, 256], sizes = [8, 64], strides = [1, 1]} : vector<8x768xf32> to vector<8x64xf32>
    %10 = vector.extract_strided_slice %3 {offsets = [0, 512], sizes = [8, 64], strides = [1, 1]} : vector<8x768xf32> to vector<8x64xf32>
    %cst_5 = arith.constant dense<0.000000e+00> : vector<8x8xf32>
    %11 = tpu.matmul %8, %9, %cst_5 {dimension_numbers = #tpu.dot_dimension_numbers<[1], [1], [0], [0], [0, 0, 1, 0], [], []>} : vector<8x64xf32>, vector<8x64xf32>, vector<8x8xf32> -> vector<8x8xf32>
    %cst_6 = arith.constant 6.250000e-02 : f32
    %12 = vector.broadcast %cst_6 : f32 to vector<8x8xf32>
    %13 = arith.mulf %11, %12 : vector<8x8xf32>
    %cst_7 = arith.constant -1.000000e+30 : f32
    %14 = vector.broadcast %cst_7 : f32 to vector<8x8xf32>
    %15 = arith.select %6, %13, %14 : vector<8x8xi1>, vector<8x8xf32>
    %cst_8 = arith.constant dense<0xFF800000> : vector<8xf32>
    %16 = vector.multi_reduction <maximumf>, %15, %cst_8 [1] : vector<8x8xf32> to vector<8xf32>
    %17 = vector.shape_cast %16 : vector<8xf32> to vector<8x1xf32>
    %18 = vector.broadcast %17 : vector<8x1xf32> to vector<8x8xf32>
    %19 = arith.subf %15, %18 : vector<8x8xf32>
    %20 = math.exp %19 : vector<8x8xf32>
    %cst_9 = arith.constant dense<0.000000e+00> : vector<8xf32>
    %21 = vector.multi_reduction <add>, %20, %cst_9 [1] : vector<8x8xf32> to vector<8xf32>
    %22 = vector.shape_cast %21 : vector<8xf32> to vector<8x1xf32>
    %23 = tpu.reciprocal %22 {approx = true} : vector<8x1xf32> -> vector<8x1xf32>
    %24 = vector.broadcast %23 : vector<8x1xf32> to vector<8x8xf32>
    %25 = arith.mulf %20, %24 : vector<8x8xf32>
    %cst_10 = arith.constant dense<0.000000e+00> : vector<8x64xf32>
    %26 = tpu.matmul %25, %10, %cst_10 {dimension_numbers = #tpu.dot_dimension_numbers<[1], [0], [0], [1], [0, 0, 1, 1], [], []>} : vector<8x8xf32>, vector<8x64xf32>, vector<8x64xf32> -> vector<8x64xf32>
    %c0_11 = arith.constant 0 : index
    %c0_12 = arith.constant 0 : index
    %27 = vector.load %arg3[%c0_11, %c0_12] : memref<256x256xf32, #tpu.memory_space<vmem>>, vector<64x256xf32>
    %cst_13 = arith.constant dense<0.000000e+00> : vector<8x256xf32>
    %28 = tpu.matmul %26, %27, %cst_13 {dimension_numbers = #tpu.dot_dimension_numbers<[1], [0], [0], [1], [0, 0, 1, 1], [], []>} : vector<8x64xf32>, vector<64x256xf32>, vector<8x256xf32> -> vector<8x256xf32>
    %29 = arith.addf %7, %28 : vector<8x256xf32>
    %30 = vector.extract_strided_slice %3 {offsets = [0, 64], sizes = [8, 64], strides = [1, 1]} : vector<8x768xf32> to vector<8x64xf32>
    %31 = vector.extract_strided_slice %3 {offsets = [0, 320], sizes = [8, 64], strides = [1, 1]} : vector<8x768xf32> to vector<8x64xf32>
    %32 = vector.extract_strided_slice %3 {offsets = [0, 576], sizes = [8, 64], strides = [1, 1]} : vector<8x768xf32> to vector<8x64xf32>
    %cst_14 = arith.constant dense<0.000000e+00> : vector<8x8xf32>
    %33 = tpu.matmul %30, %31, %cst_14 {dimension_numbers = #tpu.dot_dimension_numbers<[1], [1], [0], [0], [0, 0, 1, 0], [], []>} : vector<8x64xf32>, vector<8x64xf32>, vector<8x8xf32> -> vector<8x8xf32>
    %cst_15 = arith.constant 6.250000e-02 : f32
    %34 = vector.broadcast %cst_15 : f32 to vector<8x8xf32>
    %35 = arith.mulf %33, %34 : vector<8x8xf32>
    %cst_16 = arith.constant -1.000000e+30 : f32
    %36 = vector.broadcast %cst_16 : f32 to vector<8x8xf32>
    %37 = arith.select %6, %35, %36 : vector<8x8xi1>, vector<8x8xf32>
    %cst_17 = arith.constant dense<0xFF800000> : vector<8xf32>
    %38 = vector.multi_reduction <maximumf>, %37, %cst_17 [1] : vector<8x8xf32> to vector<8xf32>
    %39 = vector.shape_cast %38 : vector<8xf32> to vector<8x1xf32>
    %40 = vector.broadcast %39 : vector<8x1xf32> to vector<8x8xf32>
    %41 = arith.subf %37, %40 : vector<8x8xf32>
    %42 = math.exp %41 : vector<8x8xf32>
    %cst_18 = arith.constant dense<0.000000e+00> : vector<8xf32>
    %43 = vector.multi_reduction <add>, %42, %cst_18 [1] : vector<8x8xf32> to vector<8xf32>
    %44 = vector.shape_cast %43 : vector<8xf32> to vector<8x1xf32>
    %45 = tpu.reciprocal %44 {approx = true} : vector<8x1xf32> -> vector<8x1xf32>
    %46 = vector.broadcast %45 : vector<8x1xf32> to vector<8x8xf32>
    %47 = arith.mulf %42, %46 : vector<8x8xf32>
    %cst_19 = arith.constant dense<0.000000e+00> : vector<8x64xf32>
    %48 = tpu.matmul %47, %32, %cst_19 {dimension_numbers = #tpu.dot_dimension_numbers<[1], [0], [0], [1], [0, 0, 1, 1], [], []>} : vector<8x8xf32>, vector<8x64xf32>, vector<8x64xf32> -> vector<8x64xf32>
    %c64 = arith.constant 64 : index
    %c0_20 = arith.constant 0 : index
    %49 = vector.load %arg3[%c64, %c0_20] : memref<256x256xf32, #tpu.memory_space<vmem>>, vector<64x256xf32>
    %cst_21 = arith.constant dense<0.000000e+00> : vector<8x256xf32>
    %50 = tpu.matmul %48, %49, %cst_21 {dimension_numbers = #tpu.dot_dimension_numbers<[1], [0], [0], [1], [0, 0, 1, 1], [], []>} : vector<8x64xf32>, vector<64x256xf32>, vector<8x256xf32> -> vector<8x256xf32>
    %51 = arith.addf %29, %50 : vector<8x256xf32>
    %52 = vector.extract_strided_slice %3 {offsets = [0, 128], sizes = [8, 64], strides = [1, 1]} : vector<8x768xf32> to vector<8x64xf32>
    %53 = vector.extract_strided_slice %3 {offsets = [0, 384], sizes = [8, 64], strides = [1, 1]} : vector<8x768xf32> to vector<8x64xf32>
    %54 = vector.extract_strided_slice %3 {offsets = [0, 640], sizes = [8, 64], strides = [1, 1]} : vector<8x768xf32> to vector<8x64xf32>
    %cst_22 = arith.constant dense<0.000000e+00> : vector<8x8xf32>
    %55 = tpu.matmul %52, %53, %cst_22 {dimension_numbers = #tpu.dot_dimension_numbers<[1], [1], [0], [0], [0, 0, 1, 0], [], []>} : vector<8x64xf32>, vector<8x64xf32>, vector<8x8xf32> -> vector<8x8xf32>
    %cst_23 = arith.constant 6.250000e-02 : f32
    %56 = vector.broadcast %cst_23 : f32 to vector<8x8xf32>
    %57 = arith.mulf %55, %56 : vector<8x8xf32>
    %cst_24 = arith.constant -1.000000e+30 : f32
    %58 = vector.broadcast %cst_24 : f32 to vector<8x8xf32>
    %59 = arith.select %6, %57, %58 : vector<8x8xi1>, vector<8x8xf32>
    %cst_25 = arith.constant dense<0xFF800000> : vector<8xf32>
    %60 = vector.multi_reduction <maximumf>, %59, %cst_25 [1] : vector<8x8xf32> to vector<8xf32>
    %61 = vector.shape_cast %60 : vector<8xf32> to vector<8x1xf32>
    %62 = vector.broadcast %61 : vector<8x1xf32> to vector<8x8xf32>
    %63 = arith.subf %59, %62 : vector<8x8xf32>
    %64 = math.exp %63 : vector<8x8xf32>
    %cst_26 = arith.constant dense<0.000000e+00> : vector<8xf32>
    %65 = vector.multi_reduction <add>, %64, %cst_26 [1] : vector<8x8xf32> to vector<8xf32>
    %66 = vector.shape_cast %65 : vector<8xf32> to vector<8x1xf32>
    %67 = tpu.reciprocal %66 {approx = true} : vector<8x1xf32> -> vector<8x1xf32>
    %68 = vector.broadcast %67 : vector<8x1xf32> to vector<8x8xf32>
    %69 = arith.mulf %64, %68 : vector<8x8xf32>
    %cst_27 = arith.constant dense<0.000000e+00> : vector<8x64xf32>
    %70 = tpu.matmul %69, %54, %cst_27 {dimension_numbers = #tpu.dot_dimension_numbers<[1], [0], [0], [1], [0, 0, 1, 1], [], []>} : vector<8x8xf32>, vector<8x64xf32>, vector<8x64xf32> -> vector<8x64xf32>
    %c128 = arith.constant 128 : index
    %c0_28 = arith.constant 0 : index
    %71 = vector.load %arg3[%c128, %c0_28] : memref<256x256xf32, #tpu.memory_space<vmem>>, vector<64x256xf32>
    %cst_29 = arith.constant dense<0.000000e+00> : vector<8x256xf32>
    %72 = tpu.matmul %70, %71, %cst_29 {dimension_numbers = #tpu.dot_dimension_numbers<[1], [0], [0], [1], [0, 0, 1, 1], [], []>} : vector<8x64xf32>, vector<64x256xf32>, vector<8x256xf32> -> vector<8x256xf32>
    %73 = arith.addf %51, %72 : vector<8x256xf32>
    %74 = vector.extract_strided_slice %3 {offsets = [0, 192], sizes = [8, 64], strides = [1, 1]} : vector<8x768xf32> to vector<8x64xf32>
    %75 = vector.extract_strided_slice %3 {offsets = [0, 448], sizes = [8, 64], strides = [1, 1]} : vector<8x768xf32> to vector<8x64xf32>
    %76 = vector.extract_strided_slice %3 {offsets = [0, 704], sizes = [8, 64], strides = [1, 1]} : vector<8x768xf32> to vector<8x64xf32>
    %cst_30 = arith.constant dense<0.000000e+00> : vector<8x8xf32>
    %77 = tpu.matmul %74, %75, %cst_30 {dimension_numbers = #tpu.dot_dimension_numbers<[1], [1], [0], [0], [0, 0, 1, 0], [], []>} : vector<8x64xf32>, vector<8x64xf32>, vector<8x8xf32> -> vector<8x8xf32>
    %cst_31 = arith.constant 6.250000e-02 : f32
    %78 = vector.broadcast %cst_31 : f32 to vector<8x8xf32>
    %79 = arith.mulf %77, %78 : vector<8x8xf32>
    %cst_32 = arith.constant -1.000000e+30 : f32
    %80 = vector.broadcast %cst_32 : f32 to vector<8x8xf32>
    %81 = arith.select %6, %79, %80 : vector<8x8xi1>, vector<8x8xf32>
    %cst_33 = arith.constant dense<0xFF800000> : vector<8xf32>
    %82 = vector.multi_reduction <maximumf>, %81, %cst_33 [1] : vector<8x8xf32> to vector<8xf32>
    %83 = vector.shape_cast %82 : vector<8xf32> to vector<8x1xf32>
    %84 = vector.broadcast %83 : vector<8x1xf32> to vector<8x8xf32>
    %85 = arith.subf %81, %84 : vector<8x8xf32>
    %86 = math.exp %85 : vector<8x8xf32>
    %cst_34 = arith.constant dense<0.000000e+00> : vector<8xf32>
    %87 = vector.multi_reduction <add>, %86, %cst_34 [1] : vector<8x8xf32> to vector<8xf32>
    %88 = vector.shape_cast %87 : vector<8xf32> to vector<8x1xf32>
    %89 = tpu.reciprocal %88 {approx = true} : vector<8x1xf32> -> vector<8x1xf32>
    %90 = vector.broadcast %89 : vector<8x1xf32> to vector<8x8xf32>
    %91 = arith.mulf %86, %90 : vector<8x8xf32>
    %cst_35 = arith.constant dense<0.000000e+00> : vector<8x64xf32>
    %92 = tpu.matmul %91, %76, %cst_35 {dimension_numbers = #tpu.dot_dimension_numbers<[1], [0], [0], [1], [0, 0, 1, 1], [], []>} : vector<8x8xf32>, vector<8x64xf32>, vector<8x64xf32> -> vector<8x64xf32>
    %c192 = arith.constant 192 : index
    %c0_36 = arith.constant 0 : index
    %93 = vector.load %arg3[%c192, %c0_36] : memref<256x256xf32, #tpu.memory_space<vmem>>, vector<64x256xf32>
    %cst_37 = arith.constant dense<0.000000e+00> : vector<8x256xf32>
    %94 = tpu.matmul %92, %93, %cst_37 {dimension_numbers = #tpu.dot_dimension_numbers<[1], [0], [0], [1], [0, 0, 1, 1], [], []>} : vector<8x64xf32>, vector<64x256xf32>, vector<8x256xf32> -> vector<8x256xf32>
    %95 = arith.addf %73, %94 : vector<8x256xf32>
    %c0_38 = arith.constant 0 : index
    %c0_39 = arith.constant 0 : index
    %96 = vector.load %arg4[%c0_38, %c0_39] : memref<1x256xf32, #tpu.memory_space<vmem>>, vector<1x256xf32>
    %97 = vector.broadcast %96 : vector<1x256xf32> to vector<8x256xf32>
    %98 = arith.addf %95, %97 : vector<8x256xf32>
    %c0_40 = arith.constant 0 : index
    %c0_41 = arith.constant 0 : index
    %c0_42 = arith.constant 0 : index
    %99 = vector.load %arg5[%c0_40, %c0_41, %c0_42] : memref<1x8x256xf32, #tpu.memory_space<vmem>>, vector<1x8x256xf32>
    %100 = vector.shape_cast %99 : vector<1x8x256xf32> to vector<8x256xf32>
    %101 = vector.shape_cast %98 : vector<8x256xf32> to vector<1x8x256xf32>
    tpu.vector_store %arg5[%c0_40, %c0_41, %c0_42], %101 {strides = array<i32>} : memref<1x8x256xf32, #tpu.memory_space<vmem>>, vector<1x8x256xf32>,
    return
  }
  func.func @transform_0(%arg0: i32) -> (i32, i32, i32) {
    %c0_i32 = arith.constant 0 : i32
    %c0_i32_0 = arith.constant 0 : i32
    %c0_i32_1 = arith.constant 0 : i32
    return %arg0, %c0_i32, %c0_i32_0 : i32, i32, i32
  }
  func.func @transform_1(%arg0: i32) -> (i32, i32) {
    %c0_i32 = arith.constant 0 : i32
    %c0_i32_0 = arith.constant 0 : i32
    %c0_i32_1 = arith.constant 0 : i32
    return %c0_i32, %c0_i32_0 : i32, i32
  }
  func.func @transform_2(%arg0: i32) -> (i32, i32) {
    %c0_i32 = arith.constant 0 : i32
    %c0_i32_0 = arith.constant 0 : i32
    %c0_i32_1 = arith.constant 0 : i32
    return %c0_i32, %c0_i32_0 : i32, i32
  }
  func.func @transform_3(%arg0: i32) -> (i32, i32) {
    %c0_i32 = arith.constant 0 : i32
    %c0_i32_0 = arith.constant 0 : i32
    %c0_i32_1 = arith.constant 0 : i32
    return %c0_i32, %c0_i32_0 : i32, i32
  }
  func.func @transform_4(%arg0: i32) -> (i32, i32, i32) {
    %c0_i32 = arith.constant 0 : i32
    %c0_i32_0 = arith.constant 0 : i32
    %c0_i32_1 = arith.constant 0 : i32
    return %arg0, %c0_i32, %c0_i32_0 : i32, i32, i32
  }
}

</mosaic_0001>

<bundles_post_ra>
// kernel: multi_head_attention.1
= control target key start
LH: loop header
LB: loop body
LE: loop exit
PB: predicated region body
PF: predicated region fallthrough
CT: control target
= control target key end

     0   :  { %9 = vsyncpa [#allocation3], 0  ;;  %s2347_s0 = inlined_call_operand.vmem [shape: f32[2,8,256], index: 0, kind: input, shape index: {}]   ;;  %s2348_s1 = inlined_call_operand.vmem [shape: f32[256,768], index: 1, kind: input, shape index: {}]   ;;  %s2349_s2 = inlined_call_operand.vmem [shape: f32[256,256], index: 2, kind: input, shape index: {}]   ;;  %s2350_s3 = inlined_call_operand.vmem [shape: f32[1,256], index: 3, kind: input, shape index: {}]   ;;  %s2351_s4 = inlined_call_operand.hbm [shape: f32[2,8,256], index: 4, kind: output, shape index: {}]  }
   0x1   :  { %11 = vsyncpa [#allocation3 + $0x1], 0  ;;  %s1403_s15 = smov 0   ;;  %s1405_s16 = smov 0  }
   0x2   :  { %s1407_s17 = smov 0   ;;  %s1409_s18 = smov 0  }
   0x3 LB: > { %s1424_s19 = sadd.s32 4294967295, %s1375_s18   ;;  %s1223_s20 = sadd.s32 4294967294, %s1375_s18   ;;  %s1375_s18 = sphi %s1409_s18, %s2357_s18   ;;  %s1371_s17 = sphi %s1407_s17, %s2356_s17   ;;  %s1367_s16 = sphi %s1405_s16, %s2355_s16   ;;  %s1363_s15 = sphi %s1403_s15, %s2354_s15  }
   0x4   : > { %s1428_s21 = sadd.s32 1, %s1375_s18   ;;  %s113_s22 = sadd.s32 1, %s1371_s17 }
   0x5   : > { %s110_s23 = ssub.s32 %s1375_s18, %s1428_s21  ;;  %p123_p0 = scmp.ne.s32.totalorder %s1371_s17, %s1367_s16 }
   0x6   : > { %p111_p1 = scmp.eq.s32.totalorder %s110_s23, 0  ;;  %p124_p2 = scmp.eq.s32.totalorder %s1424_s19, 1 }
   0x7   : > { %p129_p3 = scmp.ne.s32.totalorder %s1367_s16, %s1363_s15  ;;  %p130_p4 = scmp.eq.s32.totalorder %s1223_s20, 1 }
   0x8   : > { %s1439_s24 = scalar_select %p111_p1, %s1371_s17, %s113_s22  }
   0x9   : > { %p1441_p5 = por %p124_p2, %p123_p0  ;;  %p1445_p6 = por %p130_p4, %p129_p3 }
   0xa   : > { %p1226_p7 = scmp.ge.s32.totalorder %s1375_s18, 1  ;;  %p165_p8 = scmp.lt.s32.totalorder %s1375_s18, 3 }
   0xc   : > { %p166_p9 = pnand %p1226_p7, %p165_p8 }
   0xd   : > { %p191_p10 = scmp.lt.s32.totalorder (!%p166_p9), %s1424_s19, 1  ;;  %s1377_s27 = smov (!%p166_p9), 64  }
   0xe   : > { %169 = sbr.rel (%p166_p9) target bundleno = 1526 (0x5f6), region = 36  ;;  %s188_s30 = sand.u32 (!%p166_p9), 1, %s1367_s16  }
   0xf   : > { %s1227_s5 = sshll.u32 (!%p166_p9), %s188_s30, 4  ;;  %s1256_s6 = sshll.u32 (!%p166_p9), %s1424_s19, 4 }
  0x10   : > { %s1159_s11 = scalar_lea.hbm (!%p166_p9), %s2351_s4, %s1256_s6  ;;  %s1333_s28 = scalar_lea.hbm (!%p166_p9), %s2351_s4, 32 }
  0x11   : > { %s1163_s13 = sshll.u32 (!%p166_p9), %s1159_s11, 4  ;;  %s1164_s13 = int_to_ptr.hbm [resolvable:$true] %s1163_s13 }
  0x12   : > { %s1327_s22 = sshra.s32 (!%p166_p9), %s1164_s13, 4  ;;  %s1328_s22 = int_to_ptr.hbm [resolvable:$true] %s1327_s22 }
  0x13   : > { %v288_v0 = vld [vmem:[%s2348_s1 + $0x2d0] sm:$0xff]  ;;  %v282_v2 = vld [vmem:[%s2348_s1 + $0x2a0] sm:$0xff]  ;;  %s192_s20 = scalar_select %p191_p10, %s1424_s19, 1  ;;  %v289_v38 = vld [vmem:[%s2348_s1 + $0x2d8] sm:$0xff]  ;;  %vm635_vm0 = vcmask 523264   ;;  %vm664_vm2 = vcmask 64512  }
  0x14   : > { %v384_v1 = vld [vmem:[%s2348_s1 + $0x5d0] sm:$0xff]  ;;  %390 = vmatpush.msra.mxu0 %v288_v0  ;;  %v378_v3 = vld [vmem:[%s2348_s1 + $0x5a0] sm:$0xff]  ;;  %v283_v41 = vld [vmem:[%s2348_s1 + $0x2a8] sm:$0xff]  ;;  %430 = vmatpush.msra.mxu2 %v289_v38  ;;  %s190_s19 = scalar_lea.vmem [#allocation2], %s1227_s5  ;;  %s1329_s23 = scalar_lea.hbm %s1328_s22, 16 }
  0x15   : > { %410 = vmatpush.msra.mxu1 %v384_v1  ;;  %v276_v4 = vld [vmem:[%s2348_s1 + $0x270] sm:$0xff]  ;;  %v270_v6 = vld [vmem:[%s2348_s1 + $0x240] sm:$0xff]  ;;  %s1255_s7 = sshll.u32 %s192_s20, 4  ;;  %v277_v44 = vld [vmem:[%s2348_s1 + $0x278] sm:$0xff]  ;;  %s1161_s12 = sshll.u32 %s190_s19, 4  ;;  %s1162_s12 = int_to_ptr.vmem [resolvable:$true] %s1161_s12 }
  0x16   : > { %v372_v5 = vld [vmem:[%s2348_s1 + $0x570] sm:$0xff]  ;;  %391 = vmatpush.msra.mxu0 %v282_v2  ;;  %v366_v7 = vld [vmem:[%s2348_s1 + $0x540] sm:$0xff]  ;;  %s195_s14 = scalar_lea.vmem %s2347_s0, %s1255_s7  ;;  %431 = vmatpush.msra.mxu2 %v283_v41  ;;  %v271_v47 = vld [vmem:[%s2348_s1 + $0x248] sm:$0xff]  ;;  %p1330_p11 = scmp.ne.s32.totalorder %s1328_s22, %s1329_s23 }
  0x17   : > { %411 = vmatpush.msra.mxu1 %v378_v3  ;;  %v264_v8 = vld [vmem:[%s2348_s1 + $0x210] sm:$0xff]  ;;  %v258_v10 = vld [vmem:[%s2348_s1 + $0x1e0] sm:$0xff]  ;;  %v1560_v35 = vld [vmem:[%s195_s14 + $0x8] sm:$0xff]  ;;  %p1334_p0 = scmp.lt.s32.totalorder %s1328_s22, %s2351_s4  ;;  %p1335_p1 = scmp.lt.s32.totalorder %s1333_s28, %s1329_s23 }
  0x18   : > { %392 = vmatpush.msra.mxu0 %v276_v4  ;;  %v360_v9 = vld [vmem:[%s2348_s1 + $0x510] sm:$0xff]  ;;  %v354_v11 = vld [vmem:[%s2348_s1 + $0x4e0] sm:$0xff]  ;;  %432 = vmatpush.msra.mxu2 %v277_v44  ;;  %v265_v50 = vld [vmem:[%s2348_s1 + $0x218] sm:$0xff]  ;;  %p1331_p12 = pnand %p1330_p11, %p1441_p5 }
  0x19   : > { %412 = vmatpush.msra.mxu1 %v372_v5  ;;  %v252_v12 = vld [vmem:[%s2348_s1 + $0x1b0] sm:$0xff]  ;;  %v246_v14 = vld [vmem:[%s2348_s1 + $0x180] sm:$0xff]  ;;  %v259_v53 = vld [vmem:[%s2348_s1 + $0x1e8] sm:$0xff]  ;;  %p1336_p2 = por %p1335_p1, %p1334_p0 }
  0x1a   : > { %393 = vmatpush.msra.mxu0 %v270_v6  ;;  %v348_v13 = vld [vmem:[%s2348_s1 + $0x4b0] sm:$0xff]  ;;  %v342_v15 = vld [vmem:[%s2348_s1 + $0x480] sm:$0xff]  ;;  %433 = vmatpush.msra.mxu2 %v271_v47  ;;  %v253_v56 = vld [vmem:[%s2348_s1 + $0x1b8] sm:$0xff]  ;;  %p1332_p13 = pneg %p1331_p12 }
  0x1b   : > { %413 = vmatpush.msra.mxu1 %v366_v7  ;;  %v240_v16 = vld [vmem:[%s2348_s1 + $0x150] sm:$0xff]  ;;  %v234_v18 = vld [vmem:[%s2348_s1 + $0x120] sm:$0xff]  ;;  %v247_v59 = vld [vmem:[%s2348_s1 + $0x188] sm:$0xff] }
  0x1c   : > { %394 = vmatpush.msra.mxu0 %v264_v8  ;;  %v336_v17 = vld [vmem:[%s2348_s1 + $0x450] sm:$0xff]  ;;  %v330_v19 = vld [vmem:[%s2348_s1 + $0x420] sm:$0xff]  ;;  %434 = vmatpush.msra.mxu2 %v265_v50  ;;  %v241_v62 = vld [vmem:[%s2348_s1 + $0x158] sm:$0xff]  ;;  %p1337_p3 = pnand %p1336_p2, %p1332_p13 }
  0x1d   : > { %414 = vmatpush.msra.mxu1 %v360_v9  ;;  %v228_v20 = vld [vmem:[%s2348_s1 + $0xf0] sm:$0xff]  ;;  %v222_v22 = vld [vmem:[%s2348_s1 + $0xc0] sm:$0xff]  ;;  %v235_v1 = vld [vmem:[%s2348_s1 + $0x128] sm:$0xff] }
  0x1e   : > { %395 = vmatpush.msra.mxu0 %v258_v10  ;;  %v324_v21 = vld [vmem:[%s2348_s1 + $0x3f0] sm:$0xff]  ;;  %v318_v23 = vld [vmem:[%s2348_s1 + $0x3c0] sm:$0xff]  ;;  %435 = vmatpush.msra.mxu2 %v259_v53  ;;  %v229_v4 = vld [vmem:[%s2348_s1 + $0xf8] sm:$0xff] }
  0x1f   : > { %415 = vmatpush.msra.mxu1 %v354_v11  ;;  %v216_v24 = vld [vmem:[%s2348_s1 + $0x90] sm:$0xff]  ;;  %v210_v26 = vld [vmem:[%s2348_s1 + $0x60] sm:$0xff]  ;;  %v223_v7 = vld [vmem:[%s2348_s1 + $0xc8] sm:$0xff] }
  0x20   : > { %396 = vmatpush.msra.mxu0 %v252_v12  ;;  %v312_v25 = vld [vmem:[%s2348_s1 + $0x390] sm:$0xff]  ;;  %v306_v27 = vld [vmem:[%s2348_s1 + $0x360] sm:$0xff]  ;;  %436 = vmatpush.msra.mxu2 %v253_v56  ;;  %v217_v10 = vld [vmem:[%s2348_s1 + $0x98] sm:$0xff] }
  0x21   : > { %416 = vmatpush.msra.mxu1 %v348_v13  ;;  %v204_v28 = vld [vmem:[%s2348_s1 + $0x30] sm:$0xff]  ;;  %v198_v30 = vld [vmem:[%s2348_s1] sm:$0xff]  ;;  %v211_v13 = vld [vmem:[%s2348_s1 + $0x68] sm:$0xff] }
  0x22   : > { %397 = vmatpush.msra.mxu0 %v246_v14  ;;  %v300_v29 = vld [vmem:[%s2348_s1 + $0x330] sm:$0xff]  ;;  %v294_v31 = vld [vmem:[%s2348_s1 + $0x300] sm:$0xff]  ;;  %437 = vmatpush.msra.mxu2 %v247_v59  ;;  %v281_v38 = vld [vmem:[%s2348_s1 + $0x298] sm:$0xff] }
  0x23   : > { %417 = vmatpush.msra.mxu1 %v342_v15  ;;  %v290_v32 = vld [vmem:[%s2348_s1 + $0x2e0] sm:$0xff]  ;;  %v284_v36 = vld [vmem:[%s2348_s1 + $0x2b0] sm:$0xff]  ;;  %v263_v41 = vld [vmem:[%s2348_s1 + $0x208] sm:$0xff] }
  0x24   : > { %398 = vmatpush.msra.mxu0 %v240_v16  ;;  %v386_v33 = vld [vmem:[%s2348_s1 + $0x5e0] sm:$0xff]  ;;  %v380_v37 = vld [vmem:[%s2348_s1 + $0x5b0] sm:$0xff]  ;;  %438 = vmatpush.msra.mxu2 %v241_v62  ;;  %v205_v16 = vld [vmem:[%s2348_s1 + $0x38] sm:$0xff] }
  0x25   : > { %418 = vmatpush.msra.mxu1 %v336_v17  ;;  %v1558_v34 = vld [vmem:[%s195_s14] sm:$0xff]  ;;  %v272_v42 = vld [vmem:[%s2348_s1 + $0x250] sm:$0xff]  ;;  %v199_v17 = vld [vmem:[%s2348_s1 + $0x8] sm:$0xff]  ;;  %s1148_s14 = scalar_lea.sflag [#allocation3], %s188_s30 }
  0x26   : > { %399 = vmatpush.msra.mxu0 %v234_v18  ;;  %v278_v39 = vld [vmem:[%s2348_s1 + $0x280] sm:$0xff]  ;;  %v368_v43 = vld [vmem:[%s2348_s1 + $0x550] sm:$0xff]  ;;  %439 = vmatpush.msra.mxu2 %v235_v1  ;;  %v291_v18 = vld [vmem:[%s2348_s1 + $0x2e8] sm:$0xff] }
  0x27   : > { %419 = vmatpush.msra.mxu1 %v330_v19  ;;  %v374_v40 = vld [vmem:[%s2348_s1 + $0x580] sm:$0xff]  ;;  %v260_v48 = vld [vmem:[%s2348_s1 + $0x1f0] sm:$0xff]  ;;  %v285_v19 = vld [vmem:[%s2348_s1 + $0x2b8] sm:$0xff] }
  0x28   : > { %400 = vmatpush.msra.mxu0 %v228_v20  ;;  %v266_v45 = vld [vmem:[%s2348_s1 + $0x220] sm:$0xff]  ;;  %v356_v49 = vld [vmem:[%s2348_s1 + $0x4f0] sm:$0xff]  ;;  %440 = vmatpush.msra.mxu2 %v229_v4  ;;  %v279_v20 = vld [vmem:[%s2348_s1 + $0x288] sm:$0xff] }
  0x29   : > { %420 = vmatpush.msra.mxu1 %v324_v21  ;;  %v362_v46 = vld [vmem:[%s2348_s1 + $0x520] sm:$0xff]  ;;  %v248_v54 = vld [vmem:[%s2348_s1 + $0x190] sm:$0xff]  ;;  %v273_v21 = vld [vmem:[%s2348_s1 + $0x258] sm:$0xff] }
  0x2a   : > { %401 = vmatpush.msra.mxu0 %v222_v22  ;;  %v254_v51 = vld [vmem:[%s2348_s1 + $0x1c0] sm:$0xff]  ;;  %v344_v55 = vld [vmem:[%s2348_s1 + $0x490] sm:$0xff]  ;;  %441 = vmatpush.msra.mxu2 %v223_v7  ;;  %v267_v22 = vld [vmem:[%s2348_s1 + $0x228] sm:$0xff] }
  0x2b   : > { %421 = vmatpush.msra.mxu1 %v318_v23  ;;  %v350_v52 = vld [vmem:[%s2348_s1 + $0x4c0] sm:$0xff]  ;;  %v236_v60 = vld [vmem:[%s2348_s1 + $0x130] sm:$0xff]  ;;  %v261_v23 = vld [vmem:[%s2348_s1 + $0x1f8] sm:$0xff] }
  0x2c   : > { %402 = vmatpush.msra.mxu0 %v216_v24  ;;  %v242_v57 = vld [vmem:[%s2348_s1 + $0x160] sm:$0xff]  ;;  %v332_v61 = vld [vmem:[%s2348_s1 + $0x430] sm:$0xff]  ;;  %442 = vmatpush.msra.mxu2 %v217_v10  ;;  %v255_v24 = vld [vmem:[%s2348_s1 + $0x1c8] sm:$0xff] }
  0x2d   : > { %422 = vmatpush.msra.mxu1 %v312_v25  ;;  %v338_v58 = vld [vmem:[%s2348_s1 + $0x460] sm:$0xff]  ;;  %v224_v2 = vld [vmem:[%s2348_s1 + $0xd0] sm:$0xff]  ;;  %v249_v25 = vld [vmem:[%s2348_s1 + $0x198] sm:$0xff] }
  0x2e   : > { %403 = vmatpush.msra.mxu0 %v210_v26  ;;  %v230_v63 = vld [vmem:[%s2348_s1 + $0x100] sm:$0xff]  ;;  %v320_v3 = vld [vmem:[%s2348_s1 + $0x3d0] sm:$0xff]  ;;  %443 = vmatpush.msra.mxu2 %v211_v13  ;;  %v243_v26 = vld [vmem:[%s2348_s1 + $0x168] sm:$0xff] }
  0x2f   : > { %423 = vmatpush.msra.mxu1 %v306_v27  ;;  %v326_v0 = vld [vmem:[%s2348_s1 + $0x400] sm:$0xff]  ;;  %v212_v8 = vld [vmem:[%s2348_s1 + $0x70] sm:$0xff]  ;;  %v237_v27 = vld [vmem:[%s2348_s1 + $0x138] sm:$0xff] }
  0x30   : > { %404 = vmatpush.msra.mxu0 %v204_v28  ;;  %v218_v5 = vld [vmem:[%s2348_s1 + $0xa0] sm:$0xff]  ;;  %v308_v9 = vld [vmem:[%s2348_s1 + $0x370] sm:$0xff]  ;;  %444 = vmatpush.msra.mxu2 %v205_v16  ;;  %v231_v28 = vld [vmem:[%s2348_s1 + $0x108] sm:$0xff] }
  0x31   : > { %424 = vmatpush.msra.mxu1 %v300_v29  ;;  %v314_v6 = vld [vmem:[%s2348_s1 + $0x3a0] sm:$0xff]  ;;  %v200_v14 = vld [vmem:[%s2348_s1 + $0x10] sm:$0xff]  ;;  %v225_v29 = vld [vmem:[%s2348_s1 + $0xd8] sm:$0xff] }
  0x32   : > { %405 = vmatpush.msra.mxu0 %v198_v30  ;;  %v206_v11 = vld [vmem:[%s2348_s1 + $0x40] sm:$0xff]  ;;  %v296_v15 = vld [vmem:[%s2348_s1 + $0x310] sm:$0xff]  ;;  %445 = vmatpush.msra.mxu2 %v199_v17  ;;  %v219_v30 = vld [vmem:[%s2348_s1 + $0xa8] sm:$0xff] }
  0x33   : > { %425 = vmatpush.msra.mxu1 %v294_v31  ;;  %406 = vmatmul.f32.vlgmr.msra.gmra.mxu0 %v1558_v34  ;;  %v302_v12 = vld [vmem:[%s2348_s1 + $0x340] sm:$0xff]  ;;  %v213_v31 = vld [vmem:[%s2348_s1 + $0x78] sm:$0xff]  ;;  %v227_v47 = vld [vmem:[%s2348_s1 + $0xe8] sm:$0xff] }
  0x34   : > { %470 = vmatpush.msrb.mxu0 %v290_v32  ;;  %426 = vmatmul.f32.vlgmr.msra.gmra.mxu1 %v1560_v35  ;;  %v207_v32 = vld [vmem:[%s2348_s1 + $0x48] sm:$0xff]  ;;  %v245_v44 = vld [vmem:[%s2348_s1 + $0x178] sm:$0xff] }
  0x35   : > { %490 = vmatpush.msrb.mxu1 %v386_v33  ;;  %510 = vmatpush.msrb.mxu2 %v291_v18  ;;  %v201_v33 = vld [vmem:[%s2348_s1 + $0x18] sm:$0xff]  ;;  %v379_v53 = vld [vmem:[%s2348_s1 + $0x5a8] sm:$0xff] }
  0x36   : > { %471 = vmatpush.msrb.mxu0 %v284_v36  ;;  %446 = vmatmul.f32.vlgmr.msra.gmra.mxu2 %v1558_v34  ;;  %v293_v36 = vld [vmem:[%s2348_s1 + $0x2f8] sm:$0xff]  ;;  %v319_v1 = vld [vmem:[%s2348_s1 + $0x3c8] sm:$0xff] }
  0x37   : > { %491 = vmatpush.msrb.mxu1 %v380_v37  ;;  %511 = vmatpush.msrb.mxu2 %v285_v19  ;;  %v287_v37 = vld [vmem:[%s2348_s1 + $0x2c8] sm:$0xff]  ;;  %v209_v50 = vld [vmem:[%s2348_s1 + $0x58] sm:$0xff] }
  0x38   : > { %472 = vmatpush.msrb.mxu0 %v278_v39  ;;  %v275_v39 = vld [vmem:[%s2348_s1 + $0x268] sm:$0xff]  ;;  %v361_v56 = vld [vmem:[%s2348_s1 + $0x518] sm:$0xff] }
  0x39   : > { %492 = vmatpush.msrb.mxu1 %v374_v40  ;;  %512 = vmatpush.msrb.mxu2 %v279_v20  ;;  %v269_v40 = vld [vmem:[%s2348_s1 + $0x238] sm:$0xff]  ;;  %v387_v10 = vld [vmem:[%s2348_s1 + $0x5e8] sm:$0xff] }
  0x3a   : > { %473 = vmatpush.msrb.mxu0 %v272_v42  ;;  %v257_v42 = vld [vmem:[%s2348_s1 + $0x1d8] sm:$0xff]  ;;  %v351_v16 = vld [vmem:[%s2348_s1 + $0x4c8] sm:$0xff] }
  0x3b   : > { %493 = vmatpush.msrb.mxu1 %v368_v43  ;;  %513 = vmatpush.msrb.mxu2 %v273_v21  ;;  %v251_v43 = vld [vmem:[%s2348_s1 + $0x1a8] sm:$0xff]  ;;  %v337_v62 = vld [vmem:[%s2348_s1 + $0x458] sm:$0xff] }
  0x3c   : > { %474 = vmatpush.msrb.mxu0 %v266_v45  ;;  %v239_v45 = vld [vmem:[%s2348_s1 + $0x148] sm:$0xff]  ;;  %v369_v13 = vld [vmem:[%s2348_s1 + $0x558] sm:$0xff] }
  0x3d   : > { %494 = vmatpush.msrb.mxu1 %v362_v46  ;;  %514 = vmatpush.msrb.mxu2 %v267_v22  ;;  %v233_v46 = vld [vmem:[%s2348_s1 + $0x118] sm:$0xff]  ;;  %v339_v18 = vld [vmem:[%s2348_s1 + $0x468] sm:$0xff] }
  0x3e   : > { %475 = vmatpush.msrb.mxu0 %v260_v48  ;;  %v221_v48 = vld [vmem:[%s2348_s1 + $0xb8] sm:$0xff]  ;;  %v327_v20 = vld [vmem:[%s2348_s1 + $0x408] sm:$0xff] }
  0x3f   : > { %495 = vmatpush.msrb.mxu1 %v356_v49  ;;  %515 = vmatpush.msrb.mxu2 %v261_v23  ;;  %v215_v49 = vld [vmem:[%s2348_s1 + $0x88] sm:$0xff]  ;;  %v345_v17 = vld [vmem:[%s2348_s1 + $0x498] sm:$0xff] }
  0x40   : > { %476 = vmatpush.msrb.mxu0 %v254_v51  ;;  %v203_v51 = vld [vmem:[%s2348_s1 + $0x28] sm:$0xff]  ;;  %v333_v19 = vld [vmem:[%s2348_s1 + $0x438] sm:$0xff] }
  0x41   : > { %496 = vmatpush.msrb.mxu1 %v350_v52  ;;  %516 = vmatpush.msrb.mxu2 %v255_v24  ;;  %v385_v52 = vld [vmem:[%s2348_s1 + $0x5d8] sm:$0xff]  ;;  %v315_v22 = vld [vmem:[%s2348_s1 + $0x3a8] sm:$0xff] }
  0x42   : > { %477 = vmatpush.msrb.mxu0 %v248_v54  ;;  %450 = vmatpush.msra.mxu3 %v385_v52  ;;  %v373_v54 = vld [vmem:[%s2348_s1 + $0x578] sm:$0xff]  ;;  %v303_v24 = vld [vmem:[%s2348_s1 + $0x348] sm:$0xff]  ;;  %v370_v52 = vld [vmem:[%s2348_s1 + $0x560] sm:$0xff] }
  0x43   : > { %497 = vmatpush.msrb.mxu1 %v344_v55  ;;  %517 = vmatpush.msrb.mxu2 %v249_v25  ;;  %v367_v55 = vld [vmem:[%s2348_s1 + $0x548] sm:$0xff]  ;;  %v321_v21 = vld [vmem:[%s2348_s1 + $0x3d8] sm:$0xff] }
  0x44   : > { %478 = vmatpush.msrb.mxu0 %v242_v57  ;;  %451 = vmatpush.msra.mxu3 %v379_v53  ;;  %v355_v57 = vld [vmem:[%s2348_s1 + $0x4e8] sm:$0xff]  ;;  %v309_v23 = vld [vmem:[%s2348_s1 + $0x378] sm:$0xff]  ;;  %v268_v53 = vld [vmem:[%s2348_s1 + $0x230] sm:$0xff] }
  0x45   : > { %498 = vmatpush.msrb.mxu1 %v338_v58  ;;  %518 = vmatpush.msrb.mxu2 %v243_v26  ;;  %v349_v58 = vld [vmem:[%s2348_s1 + $0x4b8] sm:$0xff] }
  0x46   : > { %479 = vmatpush.msrb.mxu0 %v236_v60  ;;  %452 = vmatpush.msra.mxu3 %v373_v54  ;;  %v297_v25 = vld [vmem:[%s2348_s1 + $0x318] sm:$0xff] }
  0x47   : > { %499 = vmatpush.msrb.mxu1 %v332_v61  ;;  %519 = vmatpush.msrb.mxu2 %v237_v27  ;;  %v343_v61 = vld [vmem:[%s2348_s1 + $0x488] sm:$0xff]  ;;  %v389_v26 = vld [vmem:[%s2348_s1 + $0x5f8] sm:$0xff] }
  0x48   : > { %480 = vmatpush.msrb.mxu0 %v230_v63  ;;  %453 = vmatpush.msra.mxu3 %v367_v55  ;;  %v331_v63 = vld [vmem:[%s2348_s1 + $0x428] sm:$0xff] }
  0x49   : > { %500 = vmatpush.msrb.mxu1 %v326_v0  ;;  %520 = vmatpush.msrb.mxu2 %v231_v28  ;;  %v325_v0 = vld [vmem:[%s2348_s1 + $0x3f8] sm:$0xff]  ;;  %v383_v27 = vld [vmem:[%s2348_s1 + $0x5c8] sm:$0xff] }
  0x4a   : > { %481 = vmatpush.msrb.mxu0 %v224_v2  ;;  %454 = vmatpush.msra.mxu3 %v361_v56  ;;  %v377_v28 = vld [vmem:[%s2348_s1 + $0x598] sm:$0xff]  ;;  %v364_v56 = vld [vmem:[%s2348_s1 + $0x530] sm:$0xff] }
  0x4b   : > { %501 = vmatpush.msrb.mxu1 %v320_v3  ;;  %521 = vmatpush.msrb.mxu2 %v225_v29  ;;  %v371_v29 = vld [vmem:[%s2348_s1 + $0x568] sm:$0xff] }
  0x4c   : > { %482 = vmatpush.msrb.mxu0 %v218_v5  ;;  %455 = vmatpush.msra.mxu3 %v355_v57  ;;  %v313_v5 = vld [vmem:[%s2348_s1 + $0x398] sm:$0xff]  ;;  %v262_v57 = vld [vmem:[%s2348_s1 + $0x200] sm:$0xff] }
  0x4d   : > { %502 = vmatpush.msrb.mxu1 %v314_v6  ;;  %522 = vmatpush.msrb.mxu2 %v219_v30  ;;  %v307_v6 = vld [vmem:[%s2348_s1 + $0x368] sm:$0xff]  ;;  %v365_v30 = vld [vmem:[%s2348_s1 + $0x538] sm:$0xff] }
  0x4e   : > { %483 = vmatpush.msrb.mxu0 %v212_v8  ;;  %456 = vmatpush.msra.mxu3 %v349_v58  ;;  %v301_v8 = vld [vmem:[%s2348_s1 + $0x338] sm:$0xff]  ;;  %v358_v58 = vld [vmem:[%s2348_s1 + $0x500] sm:$0xff] }
  0x4f   : > { %503 = vmatpush.msrb.mxu1 %v308_v9  ;;  %523 = vmatpush.msrb.mxu2 %v213_v31  ;;  %v295_v9 = vld [vmem:[%s2348_s1 + $0x308] sm:$0xff] }
  0x50   : > { %484 = vmatpush.msrb.mxu0 %v206_v11  ;;  %457 = vmatpush.msra.mxu3 %v343_v61  ;;  %v381_v11 = vld [vmem:[%s2348_s1 + $0x5b8] sm:$0xff]  ;;  %v359_v31 = vld [vmem:[%s2348_s1 + $0x508] sm:$0xff]  ;;  %v250_v61 = vld [vmem:[%s2348_s1 + $0x1a0] sm:$0xff] }
  0x51   : > { %504 = vmatpush.msrb.mxu1 %v302_v12  ;;  %524 = vmatpush.msrb.mxu2 %v207_v32  ;;  %v375_v12 = vld [vmem:[%s2348_s1 + $0x588] sm:$0xff]  ;;  %v353_v32 = vld [vmem:[%s2348_s1 + $0x4d8] sm:$0xff] }
  0x52   : > { %485 = vmatpush.msrb.mxu0 %v200_v14  ;;  %458 = vmatpush.msra.mxu3 %v337_v62  ;;  %v363_v14 = vld [vmem:[%s2348_s1 + $0x528] sm:$0xff]  ;;  %v346_v62 = vld [vmem:[%s2348_s1 + $0x4a0] sm:$0xff] }
  0x53   : > { %505 = vmatpush.msrb.mxu1 %v296_v15  ;;  %486 = vmatmul.f32.vlgmr.msrb.gmra.mxu0 %v1558_v34  ;;  %v357_v15 = vld [vmem:[%s2348_s1 + $0x4f8] sm:$0xff] }
  0x54   : > { %506 = vmatmul.f32.vlgmr.msrb.gmra.mxu1 %v1560_v35  ;;  %525 = vmatpush.msrb.mxu2 %v201_v33  ;;  %v347_v33 = vld [vmem:[%s2348_s1 + $0x4a8] sm:$0xff] }
  0x55   : > { %526 = vmatmul.f32.vlgmr.msrb.gmra.mxu2 %v1558_v34  ;;  %459 = vmatpush.msra.mxu3 %v331_v63  ;;  %v244_v63 = vld [vmem:[%s2348_s1 + $0x170] sm:$0xff] }
  0x56   : > { %590 = vmatpush.msra.mxu2 %v293_v36  ;;  %v341_v36 = vld [vmem:[%s2348_s1 + $0x478] sm:$0xff] }
  0x57   : > { %460 = vmatpush.msra.mxu3 %v325_v0 }
  0x58   : > { %591 = vmatpush.msra.mxu2 %v287_v37  ;;  %v335_v37 = vld [vmem:[%s2348_s1 + $0x448] sm:$0xff] }
  0x59   : > { %461 = vmatpush.msra.mxu3 %v319_v1  ;;  %v340_v1 = vld [vmem:[%s2348_s1 + $0x470] sm:$0xff] }
  0x5a   : > { %592 = vmatpush.msra.mxu2 %v281_v38  ;;  %v329_v38 = vld [vmem:[%s2348_s1 + $0x418] sm:$0xff] }
  0x5b   : > { %462 = vmatpush.msra.mxu3 %v313_v5  ;;  %v232_v5 = vld [vmem:[%s2348_s1 + $0x110] sm:$0xff] }
  0x5c   : > { %593 = vmatpush.msra.mxu2 %v275_v39  ;;  %v323_v39 = vld [vmem:[%s2348_s1 + $0x3e8] sm:$0xff] }
  0x5d   : > { %463 = vmatpush.msra.mxu3 %v307_v6  ;;  %v630_v6 = vlaneseq }
  0x5e   : > { %594 = vmatpush.msra.mxu2 %v269_v40  ;;  %v317_v40 = vld [vmem:[%s2348_s1 + $0x3b8] sm:$0xff] }
  0x5f   : > { %464 = vmatpush.msra.mxu3 %v301_v8  ;;  %v226_v8 = vld [vmem:[%s2348_s1 + $0xe0] sm:$0xff] }
  0x60   : > { %595 = vmatpush.msra.mxu2 %v263_v41  ;;  %v311_v41 = vld [vmem:[%s2348_s1 + $0x388] sm:$0xff] }
  0x61   : > { %465 = vmatpush.msra.mxu3 %v295_v9  ;;  %v322_v9 = vld [vmem:[%s2348_s1 + $0x3e0] sm:$0xff] }
  0x62   : > { %596 = vmatpush.msra.mxu2 %v257_v42  ;;  %466 = vmatmul.f32.vlgmr.msra.gmra.mxu3 %v1560_v35  ;;  %v305_v42 = vld [vmem:[%s2348_s1 + $0x358] sm:$0xff] }
  0x63   : > { %530 = vmatpush.msrb.mxu3 %v387_v10  ;;  %v220_v10 = vld [vmem:[%s2348_s1 + $0xb0] sm:$0xff] }
  0x64   : > { %597 = vmatpush.msra.mxu2 %v251_v43  ;;  %v299_v43 = vld [vmem:[%s2348_s1 + $0x328] sm:$0xff] }
  0x65   : > { %531 = vmatpush.msrb.mxu3 %v381_v11  ;;  %v2037_v11 = vshrl.u32 %v630_v6, 7 }
  0x66   : > { %598 = vmatpush.msra.mxu2 %v245_v44 }
  0x67   : > { %532 = vmatpush.msrb.mxu3 %v375_v12  ;;  %v2039_v12 = vand.u32 127, %v630_v6  ;;  %v712_v6 = vld [vmem:[%s2349_s2 + $0x68] sm:$0xff] }
  0x68   : > { %599 = vmatpush.msra.mxu2 %v239_v45  ;;  %v292_v45 = vld [vmem:[%s2348_s1 + $0x2f0] sm:$0xff] }
  0x69   : > { %533 = vmatpush.msrb.mxu3 %v369_v13  ;;  %550 = vmatpush.msra.mxu0 %v292_v45  ;;  %v316_v13 = vld [vmem:[%s2348_s1 + $0x3b0] sm:$0xff]  ;;  %vm634_vm1 = vcmp.le.s32.totalorder %v2039_v12, %v2037_v11  ;;  %v962_v12 = vld [vmem:[%s2349_s2 + $0x178] sm:$0xff] }
  0x6a   : > { %600 = vmatpush.msra.mxu2 %v233_v46  ;;  %v286_v46 = vld [vmem:[%s2348_s1 + $0x2c0] sm:$0xff]  ;;  %v961_v11 = vld [vmem:[%s2349_s2 + $0x170] sm:$0xff] }
  0x6b   : > { %534 = vmatpush.msrb.mxu3 %v363_v14  ;;  %551 = vmatpush.msra.mxu0 %v286_v46  ;;  %v214_v14 = vld [vmem:[%s2348_s1 + $0x80] sm:$0xff] }
  0x6c   : > { %601 = vmatpush.msra.mxu2 %v227_v47  ;;  %v388_v47 = vld [vmem:[%s2348_s1 + $0x5f0] sm:$0xff] }
  0x6d   : > { %535 = vmatpush.msrb.mxu3 %v357_v15  ;;  %570 = vmatpush.msra.mxu1 %v388_v47  ;;  %v310_v15 = vld [vmem:[%s2348_s1 + $0x380] sm:$0xff] }
  0x6e   : > { %602 = vmatpush.msra.mxu2 %v221_v48  ;;  %v280_v48 = vld [vmem:[%s2348_s1 + $0x290] sm:$0xff] }
  0x6f   : > { %536 = vmatpush.msrb.mxu3 %v351_v16  ;;  %552 = vmatpush.msra.mxu0 %v280_v48  ;;  %v208_v16 = vld [vmem:[%s2348_s1 + $0x50] sm:$0xff] }
  0x70   : > { %603 = vmatpush.msra.mxu2 %v215_v49  ;;  %v382_v49 = vld [vmem:[%s2348_s1 + $0x5c0] sm:$0xff] }
  0x71   : > { %537 = vmatpush.msrb.mxu3 %v345_v17  ;;  %571 = vmatpush.msra.mxu1 %v382_v49 }
  0x72   : > { %604 = vmatpush.msra.mxu2 %v209_v50  ;;  %v376_v50 = vld [vmem:[%s2348_s1 + $0x590] sm:$0xff] }
  0x73   : > { %538 = vmatpush.msrb.mxu3 %v339_v18  ;;  %572 = vmatpush.msra.mxu1 %v376_v50  ;;  %v304_v18 = vld [vmem:[%s2348_s1 + $0x350] sm:$0xff] }
  0x74   : > { %605 = vmatpush.msra.mxu2 %v203_v51  ;;  %v274_v51 = vld [vmem:[%s2348_s1 + $0x260] sm:$0xff] }
  0x75   : > { %606 = vmatmul.f32.vlgmr.msra.gmra.mxu2 %v1558_v34  ;;  %539 = vmatpush.msrb.mxu3 %v333_v19 }
  0x76   : > { %553 = vmatpush.msra.mxu0 %v274_v51  ;;  %573 = vmatpush.msra.mxu1 %v370_v52 }
  0x77   : > { %540 = vmatpush.msrb.mxu3 %v327_v20  ;;  %v202_v20 = vld [vmem:[%s2348_s1 + $0x20] sm:$0xff] }
  0x78   : > { %554 = vmatpush.msra.mxu0 %v268_v53  ;;  %574 = vmatpush.msra.mxu1 %v364_v56 }
  0x79   : > { %541 = vmatpush.msrb.mxu3 %v321_v21  ;;  %v797_v21 = vld [vmem:[%s2349_s2 + $0xf0] sm:$0xff] }
  0x7a   : > { %555 = vmatpush.msra.mxu0 %v262_v57  ;;  %575 = vmatpush.msra.mxu1 %v358_v58 }
  0x7b   : > { %542 = vmatpush.msrb.mxu3 %v315_v22 }
  0x7d   : > { %543 = vmatpush.msrb.mxu3 %v309_v23  ;;  %v298_v23 = vld [vmem:[%s2348_s1 + $0x320] sm:$0xff] }
  0x7f   : > { %544 = vmatpush.msrb.mxu3 %v303_v24 }
  0x81   : > { %545 = vmatpush.msrb.mxu3 %v297_v25  ;;  %v795_v25 = vld [vmem:[%s2349_s2 + $0xe0] sm:$0xff] }
  0x82   : > { %546 = vmatmul.f32.vlgmr.msrb.gmra.mxu3 %v1560_v35 }
  0x83   : > { %610 = vmatpush.msra.mxu3 %v389_v26  ;;  %v798_v26 = vld [vmem:[%s2349_s2 + $0xf8] sm:$0xff] }
  0x85   : > { %611 = vmatpush.msra.mxu3 %v383_v27 }
  0x87   : > { %612 = vmatpush.msra.mxu3 %v377_v28  ;;  %v793_v28 = vld [vmem:[%s2349_s2 + $0xd0] sm:$0xff] }
  0x89   : > { %613 = vmatpush.msra.mxu3 %v371_v29  ;;  %v796_v29 = vld [vmem:[%s2349_s2 + $0xe8] sm:$0xff] }
  0x8b   : > { %614 = vmatpush.msra.mxu3 %v365_v30 }
  0x8d   : > { %615 = vmatpush.msra.mxu3 %v359_v31  ;;  %v791_v31 = vld [vmem:[%s2349_s2 + $0xc0] sm:$0xff] }
  0x8f   : > { %616 = vmatpush.msra.mxu3 %v353_v32  ;;  %v794_v32 = vld [vmem:[%s2349_s2 + $0xd8] sm:$0xff] }
  0x91   : > { %617 = vmatpush.msra.mxu3 %v347_v33  ;;  %v792_v33 = vld [vmem:[%s2349_s2 + $0xc8] sm:$0xff] }
  0x93   : > { %618 = vmatpush.msra.mxu3 %v341_v36  ;;  %v787_v36 = vld [vmem:[%s2349_s2 + $0xa0] sm:$0xff] }
  0x95   : > { %619 = vmatpush.msra.mxu3 %v335_v37  ;;  %v785_v37 = vld [vmem:[%s2349_s2 + $0x90] sm:$0xff] }
  0x97   : > { %620 = vmatpush.msra.mxu3 %v329_v38  ;;  %v788_v38 = vld [vmem:[%s2349_s2 + $0xa8] sm:$0xff] }
  0x99   : > { %621 = vmatpush.msra.mxu3 %v323_v39  ;;  %v783_v39 = vld [vmem:[%s2349_s2 + $0x80] sm:$0xff] }
  0x9b   : > { %622 = vmatpush.msra.mxu3 %v317_v40  ;;  %v786_v40 = vld [vmem:[%s2349_s2 + $0x98] sm:$0xff] }
  0x9d   : > { %623 = vmatpush.msra.mxu3 %v311_v41  ;;  %v784_v41 = vld [vmem:[%s2349_s2 + $0x88] sm:$0xff] }
  0x9f   : > { %624 = vmatpush.msra.mxu3 %v305_v42 }
  0xa1   : > { %625 = vmatpush.msra.mxu3 %v299_v43 }
  0xa2   : > { %626 = vmatmul.f32.vlgmr.msra.gmra.mxu3 %v1560_v35 }
  0xb0   : > { %v407_v59 = vpop.f32.mrf.mxu0 }
  0xb1   : > { %v427_v60 = vpop.f32.mrf.mxu1 }
  0xb2   : > { %v428_v7 = vadd.f32 %v427_v60, %v407_v59  ;;  %v256_v59 = vld [vmem:[%s2348_s1 + $0x1d0] sm:$0xff] }
  0xb3   : > { %v352_v60 = vld [vmem:[%s2348_s1 + $0x4d0] sm:$0xff]  ;;  %556 = vmatpush.msra.mxu0 %v256_v59 }
  0xb4   : > { %576 = vmatpush.msra.mxu1 %v352_v60 }
  0xb5   : > { %557 = vmatpush.msra.mxu0 %v250_v61 }
  0xb6   : > { %577 = vmatpush.msra.mxu1 %v346_v62 }
  0xb7   : > { %558 = vmatpush.msra.mxu0 %v244_v63 }
  0xb8   : > { %578 = vmatpush.msra.mxu1 %v340_v1 }
  0xb9   : > { %v1954_v44 = vpop.f32.mrf.mxu2 }
  0xd0   : > { %v487_v2 = vpop.f32.mrf.mxu0 }
  0xd1   : > { %v507_v3 = vpop.f32.mrf.mxu1 }
  0xd2   : > { %v508_v4 = vadd.f32 %v507_v3, %v487_v2  ;;  %v238_v2 = vld [vmem:[%s2348_s1 + $0x140] sm:$0xff] }
  0xd3   : > { %559 = vmatpush.msra.mxu0 %v238_v2 }
  0xd4   : > { %717 = vrot.lane.b32.xlu0 %v508_v4, %s1377_s27  ;;  %1230 = vmatpush.xpose.msk.msrb.mxu2 %vm635_vm0, %v508_v4  ;;  %v334_v4 = vld [vmem:[%s2348_s1 + $0x440] sm:$0xff] }
  0xd5   : > { %579 = vmatpush.msra.mxu1 %v334_v4  ;;  %560 = vmatpush.msra.mxu0 %v232_v5  ;;  %v714_v4 = vld [vmem:[%s2349_s2 + $0x78] sm:$0xff]  ;;  %v711_v5 = vld [vmem:[%s2349_s2 + $0x60] sm:$0xff] }
  0xd7   : > { %1231 = vmatmul.msk.f32.vlgmr.msrb.gmra.mxu2 %vm635_vm0, %v428_v7  ;;  %561 = vmatpush.msra.mxu0 %v226_v8  ;;  %v710_v8 = vld [vmem:[%s2349_s2 + $0x58] sm:$0xff] }
  0xd8   : > { %v1983_v55 = vpop.f32.mrf.mxu2 }
  0xd9   : > { %562 = vmatpush.msra.mxu0 %v220_v10  ;;  %v708_v10 = vld [vmem:[%s2349_s2 + $0x48] sm:$0xff] }
  0xdb   : > { %563 = vmatpush.msra.mxu0 %v214_v14  ;;  %v706_v14 = vld [vmem:[%s2349_s2 + $0x38] sm:$0xff] }
  0xdc   : > { %715 = vrot.lane.b32.xlu0 %v428_v7, %s1377_s27  ;;  %v328_v7 = vld [vmem:[%s2348_s1 + $0x410] sm:$0xff] }
  0xdd   : > { %580 = vmatpush.msra.mxu1 %v328_v7  ;;  %564 = vmatpush.msra.mxu0 %v208_v16  ;;  %v709_v7 = vld [vmem:[%s2349_s2 + $0x50] sm:$0xff]  ;;  %v704_v16 = vld [vmem:[%s2349_s2 + $0x28] sm:$0xff] }
  0xdf   : > { %581 = vmatpush.msra.mxu1 %v322_v9  ;;  %565 = vmatpush.msra.mxu0 %v202_v20  ;;  %v707_v9 = vld [vmem:[%s2349_s2 + $0x40] sm:$0xff]  ;;  %v700_v20 = vld [vmem:[%s2349_s2 + $0x8] sm:$0xff] }
  0xe0   : > { %566 = vmatmul.f32.vlgmr.msra.gmra.mxu0 %v1558_v34  ;;  %v789_v34 = vld [vmem:[%s2349_s2 + $0xb0] sm:$0xff] }
  0xe1   : > { %582 = vmatpush.msra.mxu1 %v316_v13  ;;  %810 = vmatpush.msrb.mxu0 %v797_v21  ;;  %v705_v13 = vld [vmem:[%s2349_s2 + $0x30] sm:$0xff] }
  0xe3   : > { %583 = vmatpush.msra.mxu1 %v310_v15  ;;  %811 = vmatpush.msrb.mxu0 %v795_v25  ;;  %v703_v15 = vld [vmem:[%s2349_s2 + $0x20] sm:$0xff] }
  0xe5   : > { %584 = vmatpush.msra.mxu1 %v304_v18  ;;  %v467_v27 = vpop.f32.mrf.mxu3  ;;  %812 = vmatpush.msrb.mxu0 %v793_v28  ;;  %v702_v18 = vld [vmem:[%s2349_s2 + $0x18] sm:$0xff] }
  0xe6   : > { %v2085_v30 = vadd.f32 %v467_v27, %v1954_v44 }
  0xe7   : > { %585 = vmatpush.msra.mxu1 %v298_v23  ;;  %813 = vmatpush.msrb.mxu0 %v791_v31 }
  0xe8   : > { %586 = vmatmul.f32.vlgmr.msra.gmra.mxu1 %v1560_v35  ;;  %v790_v35 = vld [vmem:[%s2349_s2 + $0xb8] sm:$0xff] }
  0xe9   : > { %830 = vmatpush.msrb.mxu1 %v798_v26  ;;  %814 = vmatpush.msrb.mxu0 %v789_v34 }
  0xeb   : > { %831 = vmatpush.msrb.mxu1 %v796_v29  ;;  %815 = vmatpush.msrb.mxu0 %v787_v36 }
  0xed   : > { %832 = vmatpush.msrb.mxu1 %v794_v32  ;;  %816 = vmatpush.msrb.mxu0 %v785_v37 }
  0xef   : > { %833 = vmatpush.msrb.mxu1 %v792_v33  ;;  %817 = vmatpush.msrb.mxu0 %v783_v39 }
  0xf1   : > { %834 = vmatpush.msrb.mxu1 %v790_v35 }
  0xf3   : > { %835 = vmatpush.msrb.mxu1 %v788_v38 }
  0xf5   : > { %836 = vmatpush.msrb.mxu1 %v786_v40 }
  0xf7   : > { %837 = vmatpush.msrb.mxu1 %v784_v41 }
  0xf8   : > { %v2017_v3 = vpop.f32.mrf.mxu2 }
 0x105   : > { %v547_v42 = vpop.f32.mrf.mxu3 }
 0x106   : > { %v548_v43 = vadd.f32 %v547_v42, %v1983_v55 }
 0x108   : > { %1240 = vmatpush.xpose.msk.msra.mxu0 %vm635_vm0, %v548_v43 }
 0x125   : > { %v627_v44 = vpop.f32.mrf.mxu3 }
 0x126   : > { %v2124_v45 = vadd.f32 %v627_v44, %v2017_v3  ;;  %v713_v3 = vld [vmem:[%s2349_s2 + $0x70] sm:$0xff] }
 0x128   : > { %942 = vmatpush.msra.mxu1 %v2124_v45 }
 0x146   : > { %v718_v54 = vpop.permute.xlu0 %717 }
 0x147   : > { %1233 = vmatpush.xpose.msk.msra.mxu2 %vm635_vm0, %v718_v54 }
 0x14b   : > { %853 = vmatpush.msrb.mxu2 %v713_v3  ;;  %v948_v3 = vld [vmem:[%s2349_s2 + $0x108] sm:$0xff] }
 0x14d   : > { %854 = vmatpush.msrb.mxu2 %v711_v5  ;;  %v1091_v5 = vld [vmem:[%s2349_s2 + $0x1f8] sm:$0xff] }
 0x14e   : > { %v716_v0 = vpop.permute.xlu0 %715 }
 0x14f   : > { %1234 = vmatmul.msk.f32.vlgmr.msra.gmra.mxu2 %vm635_vm0, %v716_v0 }
 0x150   : > { %855 = vmatpush.msrb.mxu2 %v709_v7  ;;  %v1089_v7 = vld [vmem:[%s2349_s2 + $0x1e8] sm:$0xff] }
 0x152   : > { %856 = vmatpush.msrb.mxu2 %v707_v9  ;;  %v1087_v9 = vld [vmem:[%s2349_s2 + $0x1d8] sm:$0xff] }
 0x154   : > { %857 = vmatpush.msrb.mxu2 %v705_v13  ;;  %v1085_v13 = vld [vmem:[%s2349_s2 + $0x1c8] sm:$0xff] }
 0x156   : > { %858 = vmatpush.msrb.mxu2 %v703_v15  ;;  %v1083_v15 = vld [vmem:[%s2349_s2 + $0x1b8] sm:$0xff] }
 0x15a   : > { %v659_v17 = vpop.f32.mrf.mxu2 }
 0x15b   : > { %v662_v19 = vmul.f32 0.0625, %v659_v17  ;;  %v701_v17 = vld [vmem:[%s2349_s2 + $0x10] sm:$0xff] }
 0x15c   : > { %859 = vmatpush.msrb.mxu2 %v701_v17  ;;  %v1081_v17 = vld [vmem:[%s2349_s2 + $0x1a8] sm:$0xff] }
 0x15d   : > { %v663_v22 = vsel %vm634_vm1, %v662_v19, -1e+30  ;;  %v567_v55 = vpop.f32.mrf.mxu0  ;;  %v699_v19 = vld [vmem:[%s2349_s2] sm:$0xff] }
 0x15e   : > { %v665_v24 = vsel %vm664_vm2, %v663_v22, -inf  ;;  %860 = vmatpush.msrb.mxu2 %v699_v19  ;;  %v1079_v19 = vld [vmem:[%s2349_s2 + $0x198] sm:$0xff] }
 0x15f   : > { %666 = vmax.xlane.f32.xlu1 %v665_v24 }
 0x160   : > { %974 = vmatpush.msra.mxu2 %v961_v11 }
 0x165   : > { %v587_v56 = vpop.f32.mrf.mxu1 }
 0x166   : > { %v588_v57 = vadd.f32 %v587_v56, %v567_v55  ;;  %v954_v55 = vld [vmem:[%s2349_s2 + $0x138] sm:$0xff]  ;;  %v951_v56 = vld [vmem:[%s2349_s2 + $0x120] sm:$0xff] }
 0x168   : > { %694 = vmatpush.msrb.mxu3 %v588_v57  ;;  %757 = vrot.lane.b32.xlu0 %v588_v57, %s1377_s27  ;;  %v952_v57 = vld [vmem:[%s2349_s2 + $0x128] sm:$0xff] }
 0x1d2   : > { %v740_v46 = vpop.f32.mrf.mxu2  ;;  %v667_v47 = vpop.xlane.xlu1 %666 }
 0x1d3   : > { %v743_v48 = vmul.f32 0.0625, %v740_v46  ;;  %v668_v49 = vsub.f32 %v663_v22, %v667_v47 }
 0x1d5   : > { %v669_v50 = vmul.f32 1.442695, %v668_v49  ;;  %v744_v51 = vsel %vm634_vm1, %v743_v48, -1e+30  ;;  %v959_v48 = vld [vmem:[%s2349_s2 + $0x160] sm:$0xff]  ;;  %v960_v49 = vld [vmem:[%s2349_s2 + $0x168] sm:$0xff] }
 0x1d6   : > { %v745_v52 = vsel %vm664_vm2, %v744_v51, -inf  ;;  %975 = vmatpush.msra.mxu2 %v959_v48 }
 0x1d7   : > { %1297 = vpow2.f32 %v669_v50  ;;  %746 = vmax.xlane.f32.xlu1 %v745_v52  ;;  %v958_v50 = vld [vmem:[%s2349_s2 + $0x158] sm:$0xff]  ;;  %v955_v52 = vld [vmem:[%s2349_s2 + $0x140] sm:$0xff] }
 0x1da   : > { %v758_v2 = vpop.permute.xlu0 %757 }
 0x1db   : > { %778 = vmatpush.msra.mxu3 %v758_v2  ;;  %v947_v2 = vld [vmem:[%s2349_s2 + $0x100] sm:$0xff] }
 0x1dd   : > { %v1298_v53 = vpop.eup %1297 }
 0x1de   : > { %v671_v54 = vsel %vm664_vm2, %v1298_v53, 0.0 }
 0x1df   : > { %672 = vadd.xlane.f32.xlu2 %v671_v54  ;;  %v953_v54 = vld [vmem:[%s2349_s2 + $0x130] sm:$0xff] }
 0x1f0   : > { %1010 = vrot.lane.b32.xlu1 %v548_v43, %s1377_s27 }
 0x24a   : > { %v747_v58 = vpop.xlane.xlu1 %746 }
 0x24b   : > { %v748_v59 = vsub.f32 %v744_v51, %v747_v58 }
 0x24d   : > { %v749_v60 = vmul.f32 1.442695, %v748_v59  ;;  %v949_v59 = vld [vmem:[%s2349_s2 + $0x110] sm:$0xff] }
 0x24f   : > { %1299 = vpow2.f32 %v749_v60 }
 0x252   : > { %v673_v61 = vpop.xlane.xlu2 %672 }
 0x253   : > { %1301 = vrcp.f32 %v673_v61  ;;  %v950_v61 = vld [vmem:[%s2349_s2 + $0x118] sm:$0xff] }
 0x255   : > { %v1300_v62 = vpop.eup %1299 }
 0x256   : > { %v751_v63 = vsel %vm664_vm2, %v1300_v62, 0.0 }
 0x257   : > { %752 = vadd.xlane.f32.xlu2 %v751_v63 }
 0x259   : > { %v1302_v0 = vpop.eup %1301 }
 0x25a   : > { %v675_v1 = vmul.f32 %v1302_v0, %v1298_v53  ;;  %v956_v53 = vld [vmem:[%s2349_s2 + $0x148] sm:$0xff] }
 0x25c   : > { %1232 = vmatmul.msk.f32.vlgmr.msrb.gmra.mxu3 %vm664_vm2, %v675_v1 }
 0x25d   : > { %873 = vmatpush.msrb.mxu3 %v714_v4  ;;  %v1090_v4 = vld [vmem:[%s2349_s2 + $0x1f0] sm:$0xff] }
 0x25f   : > { %874 = vmatpush.msrb.mxu3 %v712_v6  ;;  %v1088_v6 = vld [vmem:[%s2349_s2 + $0x1e0] sm:$0xff] }
 0x261   : > { %875 = vmatpush.msrb.mxu3 %v710_v8  ;;  %v1086_v8 = vld [vmem:[%s2349_s2 + $0x1d0] sm:$0xff] }
 0x262   : > { %v1011_v26 = vpop.permute.xlu1 %1010 }
 0x263   : > { %876 = vmatpush.msrb.mxu3 %v708_v10  ;;  %v1084_v10 = vld [vmem:[%s2349_s2 + $0x1c0] sm:$0xff] }
 0x265   : > { %877 = vmatpush.msrb.mxu3 %v706_v14  ;;  %v1082_v14 = vld [vmem:[%s2349_s2 + $0x1b0] sm:$0xff] }
 0x267   : > { %878 = vmatpush.msrb.mxu3 %v704_v16  ;;  %v1080_v16 = vld [vmem:[%s2349_s2 + $0x1a0] sm:$0xff] }
 0x269   : > { %879 = vmatpush.msrb.mxu3 %v702_v18  ;;  %v1078_v18 = vld [vmem:[%s2349_s2 + $0x190] sm:$0xff] }
 0x26b   : > { %880 = vmatpush.msrb.mxu3 %v700_v20  ;;  %v1076_v20 = vld [vmem:[%s2349_s2 + $0x180] sm:$0xff] }
 0x26f   : > { %1008 = vrot.lane.b32.xlu2 %v2085_v30, %s1377_s27 }
 0x2ca   : > { %v753_v21 = vpop.xlane.xlu2 %752 }
 0x2cb   : > { %1303 = vrcp.f32 %v753_v21  ;;  %v1077_v21 = vld [vmem:[%s2349_s2 + $0x188] sm:$0xff] }
 0x2d1   : > { %v1304_v22 = vpop.eup %1303 }
 0x2d2   : > { %v755_v23 = vmul.f32 %v1304_v22, %v1300_v62  ;;  %v1009_v27 = vpop.permute.xlu2 %1008 }
 0x2d4   : > { %1235 = vmatmul.msk.f32.vlgmr.msra.gmra.mxu3 %vm664_vm2, %v755_v23 }
 0x2d5   : > { %994 = vmatpush.msra.mxu3 %v962_v12 }
 0x2d7   : > { %995 = vmatpush.msra.mxu3 %v960_v49 }
 0x2d9   : > { %996 = vmatpush.msra.mxu3 %v958_v50 }
 0x2db   : > { %997 = vmatpush.msra.mxu3 %v956_v53 }
 0x2dd   : > { %998 = vmatpush.msra.mxu3 %v954_v55 }
 0x2df   : > { %v696_v24 = vpop.f32.mrf.mxu3  ;;  %999 = vmatpush.msra.mxu3 %v952_v57 }
 0x2e0   : > { %1238 = vmatmul.msk.f32.vlgmr.msrb.gmra.mxu2 %vm635_vm0, %v696_v24  ;;  %1239 = vmatmul.msk.f32.vlgmr.msrb.gmra.mxu3 %vm635_vm0, %v696_v24 }
 0x2e1   : > { %1000 = vmatpush.msra.mxu3 %v950_v61 }
 0x2e3   : > { %1001 = vmatpush.msra.mxu3 %v948_v3 }
 0x357   : > { %v780_v25 = vpop.f32.mrf.mxu3 }
 0x358   : > { %1236 = vmatmul.msk.f32.vlgmr.msrb.gmra.mxu0 %vm635_vm0, %v780_v25  ;;  %1237 = vmatmul.msk.f32.vlgmr.msrb.gmra.mxu1 %vm635_vm0, %v780_v25 }
 0x359   : > { %1245 = vmatpush.xpose.msk.msrb.mxu0 %vm635_vm0, %v1011_v26 }
 0x360   : > { %1241 = vmatmul.msk.f32.vlgmr.msra.gmra.mxu0 %vm635_vm0, %v2085_v30 }
 0x361   : > { %1103 = vmatpush.msra.mxu0 %v1090_v4 }
 0x363   : > { %1104 = vmatpush.msra.mxu0 %v1088_v6  ;;  %v862_v25 = vpop.f32.mrf.mxu2  ;;  %v882_v26 = vpop.f32.mrf.mxu3 }
 0x365   : > { %1105 = vmatpush.msra.mxu0 %v1086_v8 }
 0x367   : > { %1106 = vmatpush.msra.mxu0 %v1084_v10 }
 0x368   : > { %1246 = vmatmul.msk.f32.vlgmr.msrb.gmra.mxu0 %vm635_vm0, %v1009_v27 }
 0x369   : > { %1107 = vmatpush.msra.mxu0 %v1082_v14 }
 0x36b   : > { %1108 = vmatpush.msra.mxu0 %v1080_v16 }
 0x36d   : > { %1109 = vmatpush.msra.mxu0 %v1078_v18 }
 0x36f   : > { %1110 = vmatpush.msra.mxu0 %v1076_v20 }
 0x3d5   : > { %v2195_v28 = vpop.f32.mrf.mxu0  ;;  %v839_v22 = vpop.f32.mrf.mxu1 }
 0x3dd   : > { %v908_v29 = vpop.f32.mrf.mxu0 }
 0x3de   : > { %v911_v31 = vmul.f32 0.0625, %v908_v29 }
 0x3e0   : > { %v912_v32 = vsel %vm634_vm1, %v911_v31, -1e+30  ;;  %v1137_v31 = vld [vmem:[%s2350_s3] sm:$0x3] }
 0x3e1   : > { %v913_v34 = vsel %vm664_vm2, %v912_v32, -inf }
 0x3e2   : > { %914 = vmax.xlane.f32.xlu0 %v913_v34  ;;  %v883_v34 = vadd.f32 %v882_v26, %v839_v22 }
 0x3e5   : > { %v1033_v33 = vpop.f32.mrf.mxu0 }
 0x3e6   : > { %v1036_v36 = vmul.f32 0.0625, %v1033_v33 }
 0x3e8   : > { %v1037_v30 = vsel %vm634_vm1, %v1036_v36, -1e+30 }
 0x3e9   : > { %v1038_v35 = vsel %vm664_vm2, %v1037_v30, -inf }
 0x3ea   : > { %1039 = vmax.xlane.f32.xlu2 %v1038_v35  ;;  %v1140_v35 = vperm.slane %v1137_v31, 1 }
 0x455   : > { %v915_v37 = vpop.xlane.xlu0 %914 }
 0x456   : > { %v916_v38 = vsub.f32 %v912_v32, %v915_v37  ;;  %v863_v32 = vadd.f32 %v862_v25, %v2195_v28 }
 0x458   : > { %v917_v39 = vmul.f32 1.442695, %v916_v38 }
 0x45a   : > { %1305 = vpow2.f32 %v917_v39 }
 0x45d   : > { %v1040_v40 = vpop.xlane.xlu2 %1039 }
 0x45e   : > { %v1041_v41 = vsub.f32 %v1037_v30, %v1040_v40  ;;  %v1139_v30 = vperm.slane %v1137_v31, 0 }
 0x460   : > { %v1306_v42 = vpop.eup %1305  ;;  %v1042_v43 = vmul.f32 1.442695, %v1041_v41 }
 0x461   : > { %v919_v44 = vsel %vm664_vm2, %v1306_v42, 0.0 }
 0x462   : > { %1307 = vpow2.f32 %v1042_v43  ;;  %920 = vadd.xlane.f32.xlu1 %v919_v44 }
 0x468   : > { %v1308_v46 = vpop.eup %1307 }
 0x469   : > { %v1044_v47 = vsel %vm664_vm2, %v1308_v46, 0.0 }
 0x46a   : > { %1045 = vadd.xlane.f32.xlu0 %v1044_v47 }
 0x47e   : > { %1050 = vrot.lane.b32.xlu0 %v2124_v45, %s1377_s27  ;;  %v957_v45 = vld [vmem:[%s2349_s2 + $0x150] sm:$0xff] }
 0x47f   : > { %976 = vmatpush.msra.mxu2 %v957_v45 }
 0x481   : > { %977 = vmatpush.msra.mxu2 %v955_v52 }
 0x483   : > { %978 = vmatpush.msra.mxu2 %v953_v54 }
 0x485   : > { %979 = vmatpush.msra.mxu2 %v951_v56 }
 0x487   : > { %980 = vmatpush.msra.mxu2 %v949_v59 }
 0x489   : > { %981 = vmatpush.msra.mxu2 %v947_v2 }
 0x4d5   : > { %v921_v51 = vpop.xlane.xlu1 %920 }
 0x4d6   : > { %1309 = vrcp.f32 %v921_v51 }
 0x4dc   : > { %v1310_v58 = vpop.eup %1309 }
 0x4dd   : > { %v923_v60 = vmul.f32 %v1310_v58, %v1306_v42  ;;  %v1046_v62 = vpop.xlane.xlu0 %1045 }
 0x4de   : > { %1311 = vrcp.f32 %v1046_v62 }
 0x4df   : > { %1242 = vmatmul.msk.f32.vlgmr.msra.gmra.mxu1 %vm664_vm2, %v923_v60 }
 0x4e4   : > { %v1312_v63 = vpop.eup %1311 }
 0x4e5   : > { %v1048_v0 = vmul.f32 %v1312_v63, %v1308_v46 }
 0x4f0   : > { %v1051_v1 = vpop.permute.xlu0 %1050 }
 0x4f1   : > { %1071 = vmatpush.msrb.mxu1 %v1051_v1 }
 0x4f2   : > { %1247 = vmatmul.msk.f32.vlgmr.msrb.gmra.mxu1 %vm664_vm2, %v1048_v0 }
 0x4f3   : > { %1123 = vmatpush.msra.mxu1 %v1091_v5 }
 0x4f5   : > { %1124 = vmatpush.msra.mxu1 %v1089_v7 }
 0x4f7   : > { %1125 = vmatpush.msra.mxu1 %v1087_v9 }
 0x4f9   : > { %1126 = vmatpush.msra.mxu1 %v1085_v13 }
 0x4fb   : > { %1127 = vmatpush.msra.mxu1 %v1083_v15 }
 0x4fd   : > { %1128 = vmatpush.msra.mxu1 %v1081_v17 }
 0x4ff   : > { %1129 = vmatpush.msra.mxu1 %v1079_v19 }
 0x501   : > { %1130 = vmatpush.msra.mxu1 %v1077_v21 }
 0x55c   : > { %v944_v23 = vpop.f32.mrf.mxu1 }
 0x55d   : > { %1243 = vmatmul.msk.f32.vlgmr.msra.gmra.mxu2 %vm635_vm0, %v944_v23  ;;  %1244 = vmatmul.msk.f32.vlgmr.msra.gmra.mxu3 %vm635_vm0, %v944_v23 }
 0x56f   : > { %v1073_v24 = vpop.f32.mrf.mxu1 }
 0x570   : > { %1248 = vmatmul.msk.f32.vlgmr.msra.gmra.mxu0 %vm635_vm0, %v1073_v24  ;;  %1249 = vmatmul.msk.f32.vlgmr.msra.gmra.mxu1 %vm635_vm0, %v1073_v24 }
 0x5e0   : > { %v983_v27 = vpop.f32.mrf.mxu2  ;;  %v1003_v29 = vpop.f32.mrf.mxu3 }
 0x5e1   : > { %v1006_v33 = vadd.f32 %v983_v27, %v863_v32  ;;  %v1007_v36 = vadd.f32 %v1003_v29, %v883_v34 }
 0x5ed   : > { %v1112_v37 = vpop.f32.mrf.mxu0  ;;  %v1132_v38 = vpop.f32.mrf.mxu1 }
 0x5ee   : > { %v1135_v39 = vadd.f32 %v1112_v37, %v1006_v33  ;;  %v1136_v40 = vadd.f32 %v1132_v38, %v1007_v36 }
 0x5f0   : > { %v1143_v41 = vadd.f32 %v1139_v30, %v1135_v39  ;;  %v1144_v42 = vadd.f32 %v1140_v35, %v1136_v40 }
 0x5f2   : > { %1145 = vst [vmem:[%s190_s19] sm:$0xff] %v1143_v41 }
 0x5f3   : > { %1146 = vst [vmem:[%s190_s19 + $0x8] sm:$0xff] %v1144_v42 }
 0x5f4   : > { %1340 = shalt.err (!%p1337_p3)
}
 0x5f5   : > { %1257 = dma.vmem_to_hbm [thread:$0]  (%p1441_p5), %s1162_s12, 256, %s1164_s13, %s1148_s14  }
 0x5f6 PF: > { %p1263_p4 = scmp.ge.s32.totalorder %s1375_s18, 2  ;;  %s1175_s30 = sand.u32 1, %s1363_s15  }
 0x5f7   : > { %s1176_s6 = scalar_lea.sflag [#allocation3], %s1175_s30 }
 0x5f8   : > { %p1260_p7 = pnand %p1263_p4, %p1445_p6 }
 0x5fa   : > { %p1261_p8 = pneg %p1260_p7 }
 0x5fc   : > { %1358 = dma.done.wait (%p1261_p8), %s1176_s6, 256  }
 0x5fd   : > { %1360 = vsyncadd (%p1261_p8), %s1176_s6, 4294967040  ;;  %p14_p9 = scmp.ge.s32.totalorder %s1428_s21, 4   ;;  %s2354_s15 = smov %s1367_s16 }
 0x5fe   : > { %s2355_s16 = smov %s1371_s17  ;;  %s2356_s17 = smov %s1439_s24 }
 0x5ff   : > { %s2357_s18 = smov %s1428_s21  ;;  %16 = sbr.rel (!%p14_p9) target bundleno = 3 (0x3), region = 71 }
 0x604   :  { %1182 = vsyncpa [#allocation3], 1 }
 0x605   :  { %1184 = vsyncpa [#allocation3 + $0x1], 1 }

</bundles_post_ra>
